<compile_context>
chip_gen: v6e
topology: v6e:2x2x1
jax: 0.10.0
libtpu: 0.0.40
codegen_flags: <defaults>
</compile_context>

<pallas_src>
import functools

import jax
import jax.numpy as jnp
from jax import lax
from jax.experimental import pallas as pl
from jax.experimental.pallas import tpu as pltpu

block_size = 4
head_size = 4
n_embd = 16


def head_kernel(x_ref, w_ref, o_ref, *, H):
    # x_ref: (1, T, C)   one batch element's activations
    # w_ref: (C, 3H)     fused [Wk | Wq * C**-0.5 | Wv]  (VMEM-resident across steps)
    # o_ref: (1, T, H)   this batch element's output
    T = x_ref.shape[1]
    x = x_ref[0].astype(jnp.float32)                               # (T, C)
    w = w_ref[...].astype(jnp.float32)                             # (C, 3H)

    # Single fused QKV projection on the MXU: (T, C) @ (C, 3H).
    kqv = jnp.dot(x, w, preferred_element_type=jnp.float32)        # (T, 3H)
    k = kqv[:, 0 * H:1 * H]                                        # (T, H)
    q = kqv[:, 1 * H:2 * H]                                        # already scaled
    v = kqv[:, 2 * H:3 * H]

    # Scores: contract the H axis directly (no explicit k.T -> no XLU transpose).
    wei = lax.dot_general(q, k, (((1,), (1,)), ((), ())),
                          preferred_element_type=jnp.float32)      # (T, T)

    # Causal mask generated in-kernel (VPU work, hides under MXU slack).
    row = lax.broadcasted_iota(jnp.int32, (T, T), 0)
    col = lax.broadcasted_iota(jnp.int32, (T, T), 1)
    wei = jnp.where(col <= row, wei, -1e30)

    # Numerically-stable softmax along the last axis; exact divide (tiny problem,
    # keeps f32-tight agreement with the reference).
    m = jnp.max(wei, axis=-1, keepdims=True)
    e = jnp.exp(wei - m)
    s = jnp.sum(e, axis=-1, keepdims=True)
    p = e / s                                                      # (T, T)

    # Dropout is identity in eval mode.
    out = jnp.dot(p, v, preferred_element_type=jnp.float32)        # (T, H)
    o_ref[0] = out.astype(o_ref.dtype)


def head_forward(x, wk, wq, wv):
    """x: (B, T, C); wk/wq/wv: (C, H) (i.e. nn.Linear weight transposed)."""
    B, T, C = x.shape
    H = wk.shape[1]

    # Fold the attention scale into Wq and fuse the three projection weights.
    # (In production: precompute once at parameter-init time, not per call.)
    scale = float(C) ** -0.5          # NOTE: reference scales by n_embd, not head_size
    w_fused = jnp.concatenate([wk, wq * scale, wv], axis=1)        # (C, 3H)

    kernel = functools.partial(head_kernel, H=H)
    out = pl.pallas_call(
        kernel,
        out_shape=jax.ShapeDtypeStruct((B, T, H), x.dtype),
        grid=(B,),
        in_specs=[
            pl.BlockSpec((1, T, C), lambda b: (b, 0, 0)),
            pl.BlockSpec((C, 3 * H), lambda b: (0, 0)),    # weight stays resident
        ],
        out_specs=pl.BlockSpec((1, T, H), lambda b: (b, 0, 0)),
        compiler_params=pltpu.CompilerParams(
            dimension_semantics=("parallel",)),            # 2 TCs on v7x; free elsewhere
    )(x, w_fused)

    return out


def _reference(x, wk, wq, wv):
    # pure-JAX reference of the PyTorch forward (eval mode)
    B, T, C = x.shape
    k = x @ wk
    q = x @ wq
    v = x @ wv
    wei = (q @ jnp.swapaxes(k, -2, -1)) * (C ** -0.5)
    mask = jnp.tril(jnp.ones((T, T), dtype=bool))
    wei = jnp.where(mask[None, :, :], wei, -jnp.inf)
    wei = jax.nn.softmax(wei, axis=-1)
    return wei @ v


if __name__ == "__main__":
    key = jax.random.PRNGKey(0)
    kx, kk, kq, kv = jax.random.split(key, 4)

    B, T, C, H = 2, block_size, n_embd, head_size
    x = jax.random.normal(kx, (B, T, C), dtype=jnp.float32)
    # deterministic synthetic weights, stored as (C, H) = Linear.weight.T
    wk = jax.random.normal(kk, (C, H), dtype=jnp.float32) * 0.1
    wq = jax.random.normal(kq, (C, H), dtype=jnp.float32) * 0.1
    wv = jax.random.normal(kv, (C, H), dtype=jnp.float32) * 0.1

    out = head_forward(x, wk, wq, wv)
    out = jax.block_until_ready(out)

    ref = _reference(x, wk, wq, wv)
    assert out.shape == (B, T, H)
    assert jnp.allclose(out, ref, atol=1e-5, rtol=1e-5), "mismatch vs reference"

    print("KERNEL_OK")
</pallas_src>

<mosaic_0001>
module attributes {stable_mosaic.version = 11 : i64} {
  func.func @head_kernel(%arg0: i32, %arg1: memref<1x4x16xf32, #tpu.memory_space<vmem>>, %arg2: memref<16x12xf32, #tpu.memory_space<vmem>>, %arg3: memref<1x4x4xf32, #tpu.memory_space<vmem>>) attributes {dimension_semantics = [#tpu.dimension_semantics<parallel>], iteration_bounds = array<i64: 2>, scalar_prefetch = 0 : i64, scratch_operands = 0 : i64, tpu.core_type = #tpu.core_type<tc>, window_params = [{transform_indices = @transform_0, window_bounds = array<i64: 1, 4, 16>}, {pipeline_mode = #tpu.pipeline_mode<synchronous>, transform_indices = @transform_1, window_bounds = array<i64: 16, 12>}, {transform_indices = @transform_2, window_bounds = array<i64: 1, 4, 4>}]} {
    %c0 = arith.constant 0 : index
    %c0_0 = arith.constant 0 : index
    %c0_1 = arith.constant 0 : index
    %0 = vector.load %arg1[%c0, %c0_0, %c0_1] : memref<1x4x16xf32, #tpu.memory_space<vmem>>, vector<1x4x16xf32>
    %1 = vector.shape_cast %0 : vector<1x4x16xf32> to vector<4x16xf32>
    %c0_2 = arith.constant 0 : index
    %c0_3 = arith.constant 0 : index
    %2 = vector.load %arg2[%c0_2, %c0_3] : memref<16x12xf32, #tpu.memory_space<vmem>>, vector<16x12xf32>
    %cst = arith.constant dense<0.000000e+00> : vector<4x12xf32>
    %3 = tpu.matmul %1, %2, %cst {dimension_numbers = #tpu.dot_dimension_numbers<[1], [0], [0], [1], [0, 0, 1, 1], [], []>} : vector<4x16xf32>, vector<16x12xf32>, vector<4x12xf32> -> vector<4x12xf32>
    %4 = vector.extract_strided_slice %3 {offsets = [0, 0], sizes = [4, 4], strides = [1, 1]} : vector<4x12xf32> to vector<4x4xf32>
    %5 = vector.extract_strided_slice %3 {offsets = [0, 4], sizes = [4, 4], strides = [1, 1]} : vector<4x12xf32> to vector<4x4xf32>
    %6 = vector.extract_strided_slice %3 {offsets = [0, 8], sizes = [4, 4], strides = [1, 1]} : vector<4x12xf32> to vector<4x4xf32>
    %cst_4 = arith.constant dense<0.000000e+00> : vector<4x4xf32>
    %7 = tpu.matmul %5, %4, %cst_4 {dimension_numbers = #tpu.dot_dimension_numbers<[1], [1], [0], [0], [0, 0, 1, 0], [], []>} : vector<4x4xf32>, vector<4x4xf32>, vector<4x4xf32> -> vector<4x4xf32>
    %8 = tpu.iota {dimensions = array<i32: 0>} : vector<4x4xi32>
    %9 = tpu.iota {dimensions = array<i32: 1>} : vector<4x4xi32>
    %10 = arith.cmpi sle, %9, %8 : vector<4x4xi32>
    %cst_5 = arith.constant -1.000000e+30 : f32
    %11 = vector.broadcast %cst_5 : f32 to vector<4x4xf32>
    %12 = arith.select %10, %7, %11 : vector<4x4xi1>, vector<4x4xf32>
    %cst_6 = arith.constant dense<0xFF800000> : vector<4xf32>
    %13 = vector.multi_reduction <maximumf>, %12, %cst_6 [1] : vector<4x4xf32> to vector<4xf32>
    %14 = vector.shape_cast %13 : vector<4xf32> to vector<4x1xf32>
    %15 = vector.broadcast %14 : vector<4x1xf32> to vector<4x4xf32>
    %16 = arith.subf %12, %15 : vector<4x4xf32>
    %17 = math.exp %16 : vector<4x4xf32>
    %cst_7 = arith.constant dense<0.000000e+00> : vector<4xf32>
    %18 = vector.multi_reduction <add>, %17, %cst_7 [1] : vector<4x4xf32> to vector<4xf32>
    %19 = vector.shape_cast %18 : vector<4xf32> to vector<4x1xf32>
    %20 = vector.broadcast %19 : vector<4x1xf32> to vector<4x4xf32>
    %21 = arith.divf %17, %20 : vector<4x4xf32>
    %cst_8 = arith.constant dense<0.000000e+00> : vector<4x4xf32>
    %22 = tpu.matmul %21, %6, %cst_8 {dimension_numbers = #tpu.dot_dimension_numbers<[1], [0], [0], [1], [0, 0, 1, 1], [], []>} : vector<4x4xf32>, vector<4x4xf32>, vector<4x4xf32> -> vector<4x4xf32>
    %c0_9 = arith.constant 0 : index
    %c0_10 = arith.constant 0 : index
    %c0_11 = arith.constant 0 : index
    %23 = vector.load %arg3[%c0_9, %c0_10, %c0_11] : memref<1x4x4xf32, #tpu.memory_space<vmem>>, vector<1x4x4xf32>
    %24 = vector.shape_cast %23 : vector<1x4x4xf32> to vector<4x4xf32>
    %25 = vector.shape_cast %22 : vector<4x4xf32> to vector<1x4x4xf32>
    tpu.vector_store %arg3[%c0_9, %c0_10, %c0_11], %25 {strides = array<i32>} : memref<1x4x4xf32, #tpu.memory_space<vmem>>, vector<1x4x4xf32>,
    return
  }
  func.func @transform_0(%arg0: i32) -> (i32, i32, i32) {
    %c0_i32 = arith.constant 0 : i32
    %c0_i32_0 = arith.constant 0 : i32
    %c0_i32_1 = arith.constant 0 : i32
    return %arg0, %c0_i32, %c0_i32_0 : i32, i32, i32
  }
  func.func @transform_1(%arg0: i32) -> (i32, i32) {
    %c0_i32 = arith.constant 0 : i32
    %c0_i32_0 = arith.constant 0 : i32
    %c0_i32_1 = arith.constant 0 : i32
    return %c0_i32, %c0_i32_0 : i32, i32
  }
  func.func @transform_2(%arg0: i32) -> (i32, i32, i32) {
    %c0_i32 = arith.constant 0 : i32
    %c0_i32_0 = arith.constant 0 : i32
    %c0_i32_1 = arith.constant 0 : i32
    return %arg0, %c0_i32, %c0_i32_0 : i32, i32, i32
  }
}

</mosaic_0001>

<bundles_post_ra>
// kernel: tpu_custom_call.1
= control target key start
LH: loop header
LB: loop body
LE: loop exit
PB: predicated region body
PF: predicated region fallthrough
CT: control target
= control target key end

     0   :  { %7 = vsyncpa [#allocation3], 0  ;;  %s954_s0 = inlined_call_operand.hbm [shape: f32[2,4,16], index: 0, kind: input, shape index: {}]   ;;  %s955_s1 = inlined_call_operand.hbm [shape: f32[16,12], index: 1, kind: input, shape index: {}]   ;;  %s956_s2 = inlined_call_operand.hbm [shape: f32[2,4,4], index: 2, kind: output, shape index: {}]  }
   0x1   :  { %9 = vsyncpa [#allocation3 + $0x1], 0 }
   0x2   :  { %10 = vsyncpa [#allocation6], 0 }
   0x3   :  { %11 = vsyncpa [#allocation4], 0 }
   0x4   :  { %13 = vsyncpa [#allocation4 + $0x1], 0  ;;  %s778_s9 = smov 0   ;;  %s780_s10 = smov 0  }
   0x5   :  { %s782_s11 = smov 0   ;;  %s784_s12 = smov 0  }
   0x6 LB: > { %s799_s13 = sadd.s32 4294967295, %s752_s12   ;;  %s520_s14 = sadd.s32 4294967294, %s752_s12   ;;  %s752_s12 = sphi %s784_s12, %s978_s12   ;;  %s748_s11 = sphi %s782_s11, %s977_s11   ;;  %s744_s10 = sphi %s780_s10, %s976_s10   ;;  %s740_s9 = sphi %s778_s9, %s975_s9  }
   0x7   : > { %p39_p0 = scmp.ne.s32.totalorder %s744_s10, %s740_s9  ;;  %p957_p1 = scmp.eq.s32.totalorder %s799_s13, 0 }
   0x8   : > { %p90_p3 = scmp.eq.s32.totalorder %s520_s14, 1  ;;  %p521_p5 = scmp.ge.s32.totalorder %s752_s12, 1 }
   0x9   : > { %p808_p4 = por %p957_p1, %p39_p0  ;;  %p97_p7 = scmp.lt.s32.totalorder %s752_s12, 3 }
   0xa   : > { %p813_p6 = por %p90_p3, %p39_p0  ;;  %s754_s18 = smov [#allocation5]  }
   0xb   : > { %s961_s15 = scalar_select %p808_p4, 1, 0 }
   0xc   : > { %s962_s16 = scalar_select %p813_p6, 1, 0 }
   0xd   : > { %p818_p8 = pnand %p521_p5, %p97_p7  ;;  %s109_s19 = sshll.u32 %s754_s18, 4  ;;  %s110_s19 = int_to_ptr.vmem [resolvable:$true] %s109_s19 }
   0xe   : > { %s832_s21 = sadd.s32 1, %s752_s12   ;;  %s26_s22 = sadd.s32 1, %s748_s11 }
   0xf   : > { %s963_s17 = scalar_select %p818_p8, 1, 0 }
  0x10   : > { %p571_p9 = pneg %p818_p8  ;;  %s23_s23 = ssub.s32 %s752_s12, %s832_s21 }
  0x11   : > { %s641_s24 = scalar_lea.vmem %s110_s19, 256  ;;  %p649_p5 = scmp.lt.s32.totalorder %s110_s19, %s110_s19 }
  0x12   : > { %p827_p11 = pnand %p571_p9, %p957_p1  ;;  %p642_p13 = scmp.ne.s32.totalorder %s110_s19, %s641_s24 }
  0x13   : > { %p650_p7 = scmp.lt.s32.totalorder %s641_s24, %s641_s24 }
  0x14   : > { %p632_p12 = pneg %p827_p11 }
  0x15   : > { %p651_p10 = por %p650_p7, %p649_p5 }
  0x16   : > { %p644_p0 = pnand %p642_p13, %p632_p12 }
  0x18   : > { %p645_p3 = pneg %p644_p0 }
  0x1a   : > { %p652_p2 = pnand %p651_p10, %p645_p3 }
  0x1c   : > { %655 = shalt.err (!%p652_p2)
}
  0x1d   : > { %s755_s25 = smov 128   ;;  %s756_s26 = smov 8  }
  0x1e   : > { %574 = dma.hbm_to_vmem [thread:$0]  (!%p827_p11), %s955_s1, 256, %s110_s19, [#allocation6], %s755_s25, %s755_s25, %s756_s26  }
  0x1f   : > { %p24_p9 = scmp.eq.s32.totalorder %s23_s23, 0  ;;  %p33_p12 = scmp.ne.s32.totalorder %s748_s11, %s744_s10 }
  0x20   : > { %p34_p10 = scmp.eq.s32.totalorder %s752_s12, 0  ;;  %p584_p2 = scmp.lt.s32.totalorder %s752_s12, 2 }
  0x21   : > { %s849_s29 = scalar_select %p24_p9, %s748_s11, %s26_s22  }
  0x22   : > { %p35_p13 = por %p34_p10, %p33_p12  ;;  %p965_p0 = scmp.eq.s32.totalorder %s799_s13, 1 }
  0x23   : > { %s123_s3 = sand.u32 1, %s748_s11   ;;  %s525_s4 = sshll.u32 %s752_s12, 6 }
  0x24   : > { %p853_p3 = por %p965_p0, %p33_p12  ;;  %s524_s5 = sshll.u32 %s123_s3, 2 }
  0x25   : > { %s862_s8 = scalar_lea.hbm %s954_s0, %s525_s4  ;;  %s127_s14 = scalar_lea.vmem [#allocation2], %s524_s5 }
  0x26   : > { %s966_s30 = scalar_select %p853_p3, 1, 0 }
  0x27   : > { %s134_s18 = sshll.u32 %s127_s14, 4  ;;  %p864_p11 = pnand %p584_p2, %p35_p13  ;;  %s135_s18 = int_to_ptr.vmem [resolvable:$true] %s134_s18 }
  0x28   : > { %s124_s20 = scalar_lea.sflag [#allocation3], %s123_s3  ;;  %s656_s22 = scalar_lea.hbm %s862_s8, 64 }
  0x29   : > { %p657_p5 = scmp.ne.s32.totalorder %s862_s8, %s656_s22  ;;  %p658_p7 = pneg %p864_p11 }
  0x2a   : > { %s661_s25 = scalar_lea.hbm %s954_s0, 128  ;;  %p662_p10 = scmp.lt.s32.totalorder %s862_s8, %s954_s0 }
  0x2b   : > { %p659_p9 = pnand %p658_p7, %p657_p5  ;;  %p663_p2 = scmp.lt.s32.totalorder %s661_s25, %s656_s22 }
  0x2d   : > { %p660_p12 = pneg %p659_p9  ;;  %p664_p13 = por %p663_p2, %p662_p10 }
  0x2f   : > { %p665_p0 = pnand %p664_p13, %p660_p12 }
  0x31   : > { %668 = shalt.err (!%p665_p0)
}
  0x32   : > { %s669_s28 = scalar_lea.vmem %s135_s18, 64  ;;  %s757_s3 = smov [#allocation2]  }
  0x33   : > { %p670_p1 = scmp.ne.s32.totalorder %s135_s18, %s669_s28  ;;  %s674_s4 = sshll.u32 %s757_s3, 4  ;;  %s675_s4 = int_to_ptr.vmem [resolvable:$false] %s674_s4 }
  0x34   : > { %s676_s5 = scalar_lea.vmem %s675_s4, 128  ;;  %p677_p5 = scmp.lt.s32.totalorder %s135_s18, %s675_s4 }
  0x35   : > { %p672_p6 = pnand %p670_p1, %p658_p7  ;;  %p678_p9 = scmp.lt.s32.totalorder %s676_s5, %s669_s28 }
  0x37   : > { %p673_p3 = pneg %p672_p6  ;;  %p679_p4 = por %p678_p9, %p677_p5 }
  0x39   : > { %p680_p8 = pnand %p679_p4, %p673_p3 }
  0x3b   : > { %683 = shalt.err (!%p680_p8)
}
  0x3c   : > { %578 = dma.hbm_to_vmem [thread:$0]  (!%p864_p11), %s862_s8, 64, %s135_s18, %s124_s20  }
  0x3d   : > { %p968_p12 = scmp.ne.s32.totalorder %s963_s17, 0 }
  0x3e   : > { %s885_s6 = sand.u32 (!%p968_p12), 1, %s744_s10   ;;  %p969_p1 = scmp.ne.s32.totalorder (!%p968_p12), %s961_s15, 0 }
  0x3f   : > { %143 = sbr.rel (%p968_p12) target bundleno = 1099 (0x44b), region = 28  ;;  %s527_s7 = sshll.u32 (!%p968_p12), %s885_s6, 2 }
  0x40   : > { %s146_s14 = scalar_lea.sflag (!%p968_p12), [#allocation3], %s885_s6  ;;  %s149_s22 = scalar_lea.vmem (!%p968_p12), [#allocation2], %s527_s7 }
  0x44   : > { %727 = dma.done.wait (%p969_p1), %s146_s14, 64  }
  0x45   : > { %729 = vsyncadd (%p969_p1), %s146_s14, 4294967232  ;;  %p970_p4 = scmp.eq.s32.totalorder %s799_s13, 0 }
  0x47   : > { %731 = dma.done.wait (%p970_p4), [#allocation6], 256   ;;  %p971_p6 = pmov %p970_p4 }
  0x48   : > { %v758_v0 = vmov 0.0   ;;  %vm759_vm0 = vmmov 0   ;;  %v176_v1 = vld [vmem:[#allocation5 + $0x8] sm:$0xff]  ;;  %v175_v2 = vld [vmem:[#allocation5] sm:$0xff]  ;;  %v174_v3 = vld [vmem:[%s149_s22] sm:$0xf]  ;;  %v329_v7 = vlaneseq }
  0x49   : > { %733 = vsyncadd (%p971_p6), [#allocation6], 4294967040  ;;  %546 = vmatprep.subr.mxu0 %v758_v0  ;;  %550 = vmatprep.mubr.msk.f32.mxu0 %vm759_vm0, %v758_v0  ;;  %vm177_vm1 = vcmask 130048   ;;  %vm254_vm2 = vcmask 31744   ;;  %s760_s15 = smov 124   ;;  %vm335_vm4 = vcmask 27648  }
  0x4a   : > { %553 = vmatprep.subr.mxu1 %v758_v0  ;;  %555 = vmatprep.mubr.msk.f32.mxu1 %vm759_vm0, %v758_v0  ;;  %v330_v8 = vshrl.u32 %v329_v7, 7  ;;  %v332_v9 = vand.u32 127, %v329_v7  ;;  %s761_s17 = smov 120   ;;  %vm352_vm5 = vcmask 1043456   ;;  %s536_s8 = sshll.u32 %s799_s13, 6 }
  0x4b   : > { %547 = vmatpush3.msra.mxu0 %v176_v1  ;;  %s173_s18 = scalar_lea.vmem [#allocation7], %s527_s7  ;;  %s910_s24 = scalar_lea.hbm %s956_s2, %s536_s8 }
  0x4c   : > { %548 = vmatprep.subr.mxu0 %v758_v0  ;;  %vm333_vm3 = vcmp.le.s32.totalorder %v332_v9, %v330_v8  ;;  %s440_s19 = sshll.u32 %s173_s18, 4  ;;  %s427_s25 = scalar_lea.sflag [#allocation4], %s885_s6  ;;  %s912_s19 = int_to_ptr.vmem [resolvable:$true] %s440_s19 }
  0x4d   : > { %549 = vmatpush3.msra.mxu0 %v175_v2  ;;  %s684_s26 = scalar_lea.vmem %s912_s19, 64  ;;  %p972_p3 = scmp.ne.s32.totalorder %s966_s30, 0 }
  0x4e   : > { %551 = vmatmul.mubr.msk.f32.vlgmr.msra.gmra.mxu0 %vm177_vm1, %v174_v3  ;;  %558 = vmatprep.subr.mxu0 %v758_v0  ;;  %p685_p8 = scmp.ne.s32.totalorder %s912_s19, %s684_s26  ;;  %s762_s13 = smov [#allocation7]  }
  0x4f   : > { %560 = vmatprep.mubr.msk.f32.mxu0 %vm759_vm0, %v758_v0  ;;  %s688_s27 = sshll.u32 %s762_s13, 4  ;;  %s689_s27 = int_to_ptr.vmem [resolvable:$false] %s688_s27 }
  0x50   : > { %p686_p11 = pnand %p685_p8, %p972_p3  ;;  %s690_s28 = scalar_lea.vmem %s689_s27, 128 }
  0x51   : > { %p691_p10 = scmp.lt.s32.totalorder %s912_s19, %s689_s27  ;;  %p692_p2 = scmp.lt.s32.totalorder %s690_s28, %s684_s26 }
  0x52   : > { %p687_p7 = pneg %p686_p11 }
  0x53   : > { %p693_p13 = por %p692_p2, %p691_p10 }
  0x55   : > { %p694_p0 = pnand %p693_p13, %p687_p7 }
 0x10e   : > { %v247_v4 = vpop.f32.mrf.mxu0 }
 0x10f   : > { %252 = vrot.lane.b32.xlu0 %v247_v4, %s760_s15  ;;  %554 = vmatpush3.xpose.msk.msra.mxu1 %vm254_vm2, %v247_v4 }
 0x110   : > { %v552_v5 = vpop.f32.mrf.mxu0 }
 0x181   : > { %v253_v6 = vpop.permute.xlu0 %252 }
 0x182   : > { %556 = vmatmul.mubr.msk.f32.vlgmr.msra.gmra.mxu1 %vm254_vm2, %v253_v6 }
 0x242   : > { %v325_v10 = vpop.f32.mrf.mxu1 }
 0x243   : > { %v334_v11 = vsel %vm333_vm3, %v325_v10, -1e+30 }
 0x244   : > { %v557_v12 = vpop.f32.mrf.mxu1  ;;  %v336_v13 = vsel %vm335_vm4, %v334_v11, -inf }
 0x245   : > { %337 = vmax.xlane.f32.xlu0 %v336_v13 }
 0x2ce   : > { %v338_v14 = vpop.xlane.xlu0 %337 }
 0x2cf   : > { %v339_v15 = vsub.f32 %v334_v11, %v338_v14 }
 0x2d1   : > { %v340_v16 = vmul.f32 1.442695, %v339_v15 }
 0x2d3   : > { %626 = vpow2.f32 %v340_v16 }
 0x2e0   : > { %v627_v17 = vpop.eup %626 }
 0x2e1   : > { %v342_v18 = vsel %vm335_vm4, %v627_v17, 0.0 }
 0x2e2   : > { %343 = vadd.xlane.f32.xlu1 %v342_v18 }
 0x2f3   : > { %347 = vrot.lane.b32.xlu1 %v247_v4, %s761_s17 }
 0x36b   : > { %v344_v19 = vpop.xlane.xlu1 %343 }
 0x36c   : > { %628 = vrcp.f32 %v344_v19 }
 0x36f   : > { %v348_v20 = vpop.permute.xlu1 %347 }
 0x370   : > { %559 = vmatpush3.msk.msra.mxu0 %vm352_vm5, %v348_v20 }
 0x379   : > { %v629_v21 = vpop.eup %628 }
 0x37a   : > { %v346_v22 = vmul.f32 %v629_v21, %v627_v17 }
 0x37c   : > { %561 = vmatmul.mubr.msk.f32.vlgmr.msra.gmra.mxu0 %vm254_vm2, %v346_v22 }
 0x43c   : > { %v421_v23 = vpop.f32.mrf.mxu0 }
 0x43d   : > { %425 = vst.msk [vmem:[%s173_s18] sm:$0xf] %vm335_vm4, %v421_v23 }
 0x43e   : > { %v562_v24 = vpop.f32.mrf.mxu0 }
 0x43f   : > { %697 = shalt.err (!%p694_p0)
}
 0x440   : > { %s698_s3 = scalar_lea.hbm %s910_s24, 64  ;;  %s702_s6 = scalar_lea.hbm %s956_s2, 128 }
 0x441   : > { %p699_p5 = scmp.ne.s32.totalorder %s910_s24, %s698_s3  ;;  %p703_p1 = scmp.lt.s32.totalorder %s910_s24, %s956_s2 }
 0x442   : > { %p704_p4 = scmp.lt.s32.totalorder %s702_s6, %s698_s3 }
 0x443   : > { %p700_p9 = pnand %p699_p5, %p972_p3 }
 0x444   : > { %p705_p6 = por %p704_p4, %p703_p1 }
 0x445   : > { %p701_p12 = pneg %p700_p9 }
 0x447   : > { %p706_p8 = pnand %p705_p6, %p701_p12 }
 0x449   : > { %709 = shalt.err (!%p706_p8)
}
 0x44a   : > { %569 = dma.vmem_to_hbm [thread:$0]  (%p972_p3), %s912_s19, 64, %s910_s24, %s427_s25  }
 0x44b PF: > { %s452_s22 = sand.u32 1, %s740_s9   ;;  %p973_p11 = scmp.ne.s32.totalorder %s962_s16, 0 }
 0x44c   : > { %p974_p7 = scmp.ge.s32.totalorder %s752_s12, 2  ;;  %s453_s15 = scalar_lea.sflag [#allocation4], %s452_s22 }
 0x44e   : > { %p580_p10 = pnand %p974_p7, %p973_p11 }
 0x450   : > { %p581_p2 = pneg %p580_p10 }
 0x452   : > { %735 = dma.done.wait (%p581_p2), %s453_s15, 64  }
 0x453   : > { %737 = vsyncadd (%p581_p2), %s453_s15, 4294967232  ;;  %p16_p13 = scmp.ge.s32.totalorder %s832_s21, 4   ;;  %s975_s9 = smov %s744_s10 }
 0x454   : > { %s976_s10 = smov %s748_s11  ;;  %s977_s11 = smov %s849_s29 }
 0x455   : > { %s978_s12 = smov %s832_s21  ;;  %18 = sbr.rel (!%p16_p13) target bundleno = 6 (0x6), region = 77 }
 0x45a   :  { %458 = vsyncpa [#allocation3], 1 }
 0x45b   :  { %460 = vsyncpa [#allocation3 + $0x1], 1 }
 0x45c   :  { %461 = vsyncpa [#allocation6], 1 }
 0x45d   :  { %462 = vsyncpa [#allocation4], 1 }
 0x45e   :  { %464 = vsyncpa [#allocation4 + $0x1], 1 }

</bundles_post_ra>
